<compile_context>
chip_gen: v7x
topology: tpu7x:2x2x1
jax: 0.10.0
libtpu: 0.0.40
codegen_flags: <defaults>
</compile_context>

<pallas_src>
import jax
import jax.numpy as jnp
from jax.experimental import pallas as pl
from jax.experimental.pallas import tpu as pltpu

BOARD_SIZE = 3
N_QUBITS = BOARD_SIZE * BOARD_SIZE          # 9
K_AUG = N_QUBITS + 1                        # 9 features + 1 bias(ones) row
PARAM_WEIGHT = 1.0                          # scales feature-map input params
LANE = 128
TN_MAX = 16384                              # max lanes per grid step (~2.4 MiB dbl-buffered)
SMALL_BATCH_PALLAS_CUTOFF = 64              # below this, plain jnp beats kernel launch cost


def qnn_kernel(w_ref, x_ref, o_ref):
    # w_ref: (9, 10)   resident folded weights [w_fold^T | theta^T]
    # x_ref: (10, TN)  transposed boards + ones row, batch on lanes
    # o_ref: (9, TN)   transposed output, batch on lanes
    z = jnp.dot(w_ref[...], x_ref[...],
                preferred_element_type=jnp.float32,
                precision=jax.lax.Precision.HIGHEST)
    # cos(.) = bounded classical surrogate of the per-qubit <Z> expectation, then Tanh.
    o_ref[...] = jnp.tanh(jnp.cos(z))


def _round_up(x, m):
    return ((x + m - 1) // m) * m


def _cdiv(a, b):
    return (a + b - 1) // b


def prepare_qnn_params(w, theta, param_weight=PARAM_WEIGHT):
    """One-time parameter setup (hoisted out of the forward pass).

    w:     (2*N_QUBITS, N_QUBITS) surrogate ansatz weights (original layout).
    theta: (1, N_QUBITS)          surrogate ansatz offsets.
    Returns W_aug of shape (N_QUBITS, N_QUBITS + 1):
      columns 0..8 = param_weight * (w[:9] + w[9:])^T   (repeat(1,2) folded)
      column  9    = theta^T                            (bias folded via ones row)
    """
    w = jnp.asarray(w, jnp.float32)
    theta = jnp.asarray(theta, jnp.float32).reshape(1, N_QUBITS)
    w_fold = param_weight * (w[:N_QUBITS, :] + w[N_QUBITS:, :])      # (9, 9)
    return jnp.concatenate([w_fold.T, theta.T], axis=1)              # (9, 10)


def _choose_tn(batch, tn=None):
    if tn is not None:
        return max(LANE, _round_up(int(tn), LANE))
    b128 = _round_up(batch, LANE)
    if b128 <= 2 * LANE:                       # too small to split usefully
        return b128
    # >= 2 grid steps so the "parallel" axis actually feeds both v7x TensorCores,
    # while keeping each tile <= TN_MAX lanes (VMEM budget safe on all generations).
    n_steps = max(2, _cdiv(b128, TN_MAX))
    return _round_up(_cdiv(b128, n_steps), LANE)


def qnn_forward_pallas(states, w_aug, *, tn=None):
    """Batched QNN forward through the Pallas kernel.

    states: (..., BOARD_SIZE, BOARD_SIZE) boards; returns (B, N_QUBITS)."""
    x = jnp.asarray(states, jnp.float32).reshape(-1, N_QUBITS)        # (B, 9)
    batch = x.shape[0]

    tn = _choose_tn(batch, tn)
    b_pad = _round_up(batch, tn)

    # Transposed, bias-augmented input: (10, B) with batch on lanes; pad ragged tail only.
    x_aug = jnp.concatenate([x.T, jnp.ones((1, batch), jnp.float32)], axis=0)
    if b_pad != batch:
        x_aug = jnp.pad(x_aug, ((0, 0), (0, b_pad - batch)))

    out_t = pl.pallas_call(
        qnn_kernel,
        out_shape=jax.ShapeDtypeStruct((N_QUBITS, b_pad), jnp.float32),
        grid=(b_pad // tn,),
        in_specs=[
            pl.BlockSpec((N_QUBITS, K_AUG), lambda i: (0, 0)),   # resident weights
            pl.BlockSpec((K_AUG, tn), lambda i: (0, i)),         # batch-on-lanes boards
        ],
        out_specs=pl.BlockSpec((N_QUBITS, tn), lambda i: (0, i)),
        compiler_params=pltpu.CompilerParams(
            dimension_semantics=("parallel",),
        ),
    )(w_aug, x_aug)

    return out_t[:, :batch].T                                         # (B, 9)


def qnn_forward_jnp(states, w_aug):
    """Plain-jnp path for tiny batches (kernel launch overhead dominates there)."""
    x = jnp.asarray(states, jnp.float32).reshape(-1, N_QUBITS)
    x_aug = jnp.concatenate([x, jnp.ones((x.shape[0], 1), jnp.float32)], axis=1)
    z = jnp.dot(x_aug, w_aug.T, precision=jax.lax.Precision.HIGHEST)
    return jnp.tanh(jnp.cos(z))


def qnn_forward(states, w_aug, *, tn=None, use_pallas=None):
    x = jnp.asarray(states, jnp.float32).reshape(-1, N_QUBITS)
    if use_pallas is None:
        use_pallas = x.shape[0] > SMALL_BATCH_PALLAS_CUTOFF
    if not use_pallas:
        return qnn_forward_jnp(states, w_aug)
    return qnn_forward_pallas(states, w_aug, tn=tn)


def surrogate_reference(states, w, theta, param_weight=PARAM_WEIGHT):
    """Pure-JAX reference of the original (un-folded) surrogate path."""
    x = jnp.asarray(states, jnp.float32).reshape(-1, N_QUBITS)
    x_rep = jnp.tile(x, (1, 2)) * param_weight
    z = jnp.dot(x_rep, jnp.asarray(w, jnp.float32),
                precision=jax.lax.Precision.HIGHEST)
    z = z + jnp.asarray(theta, jnp.float32).reshape(1, N_QUBITS)
    return jnp.tanh(jnp.cos(z))


if __name__ == "__main__":
    key = jax.random.PRNGKey(0)
    k_state, k_state2, k_w, k_theta = jax.random.split(key, 4)

    # Deterministic small inputs consistent with the module: boards are (3, 3),
    # flattened to n_qubits=9 features; repeat(1,2) implies (18, 9) weights.
    states = jax.random.normal(k_state, (2, BOARD_SIZE, BOARD_SIZE), dtype=jnp.float32)
    w = 0.1 * jax.random.normal(k_w, (2 * N_QUBITS, N_QUBITS), dtype=jnp.float32)
    theta = 0.1 * jax.random.normal(k_theta, (1, N_QUBITS), dtype=jnp.float32)

    w_aug = prepare_qnn_params(w, theta, PARAM_WEIGHT)                # one-time setup

    # 1) Small batch (matches the module's single-board style usage), kernel forced on.
    out = qnn_forward(states, w_aug, use_pallas=True)
    jax.block_until_ready(out)
    ref = surrogate_reference(states, w, theta)
    assert out.shape == (2, N_QUBITS)
    assert bool(jnp.all(jnp.isfinite(out)))
    assert bool(jnp.allclose(out, ref, atol=1e-5, rtol=1e-5))

    # 2) Larger batch exercising a multi-step grid and the ragged-tail padding path.
    states_big = jax.random.normal(k_state2, (300, BOARD_SIZE, BOARD_SIZE),
                                   dtype=jnp.float32)
    out_big = qnn_forward(states_big, w_aug)          # auto-dispatch -> pallas path
    jax.block_until_ready(out_big)
    ref_big = surrogate_reference(states_big, w, theta)
    assert out_big.shape == (300, N_QUBITS)
    assert bool(jnp.all(jnp.isfinite(out_big)))
    assert bool(jnp.allclose(out_big, ref_big, atol=1e-5, rtol=1e-5))

    print("KERNEL_OK")
</pallas_src>

<mosaic_0001>
module attributes {stable_mosaic.version = 11 : i64} {
  func.func @qnn_kernel(%arg0: i32, %arg1: memref<9x10xf32, #tpu.memory_space<vmem>>, %arg2: memref<10x128xf32, #tpu.memory_space<vmem>>, %arg3: memref<9x128xf32, #tpu.memory_space<vmem>>) attributes {dimension_semantics = [#tpu.dimension_semantics<parallel>], iteration_bounds = array<i64: 1>, scalar_prefetch = 0 : i64, scratch_operands = 0 : i64, tpu.core_type = #tpu.core_type<tc>, window_params = [{pipeline_mode = #tpu.pipeline_mode<synchronous>, transform_indices = @transform_0, window_bounds = array<i64: 9, 10>}, {transform_indices = @transform_1, window_bounds = array<i64: 10, 128>}, {transform_indices = @transform_2, window_bounds = array<i64: 9, 128>}]} {
    %c0 = arith.constant 0 : index
    %c0_0 = arith.constant 0 : index
    %0 = vector.load %arg1[%c0, %c0_0] : memref<9x10xf32, #tpu.memory_space<vmem>>, vector<9x10xf32>
    %c0_1 = arith.constant 0 : index
    %c0_2 = arith.constant 0 : index
    %1 = vector.load %arg2[%c0_1, %c0_2] : memref<10x128xf32, #tpu.memory_space<vmem>>, vector<10x128xf32>
    %cst = arith.constant dense<0.000000e+00> : vector<9x128xf32>
    %2 = tpu.matmul %0, %1, %cst {dimension_numbers = #tpu.dot_dimension_numbers<[1], [0], [0], [1], [0, 0, 1, 1], [], []>, precision = #tpu.contract_precision<fp32>} : vector<9x10xf32>, vector<10x128xf32>, vector<9x128xf32> -> vector<9x128xf32>
    %3 = math.cos %2 : vector<9x128xf32>
    %4 = math.tanh %3 : vector<9x128xf32>
    %c0_3 = arith.constant 0 : index
    %c0_4 = arith.constant 0 : index
    %5 = vector.load %arg3[%c0_3, %c0_4] : memref<9x128xf32, #tpu.memory_space<vmem>>, vector<9x128xf32>
    tpu.vector_store %arg3[%c0_3, %c0_4], %4 {strides = array<i32>} : memref<9x128xf32, #tpu.memory_space<vmem>>, vector<9x128xf32>,
    return
  }
  func.func @transform_0(%arg0: i32) -> (i32, i32) {
    %c0_i32 = arith.constant 0 : i32
    %c0_i32_0 = arith.constant 0 : i32
    %c0_i32_1 = arith.constant 0 : i32
    return %c0_i32, %c0_i32_0 : i32, i32
  }
  func.func @transform_1(%arg0: i32) -> (i32, i32) {
    %c0_i32 = arith.constant 0 : i32
    %c0_i32_0 = arith.constant 0 : i32
    return %c0_i32, %arg0 : i32, i32
  }
  func.func @transform_2(%arg0: i32) -> (i32, i32) {
    %c0_i32 = arith.constant 0 : i32
    %c0_i32_0 = arith.constant 0 : i32
    return %c0_i32, %arg0 : i32, i32
  }
}

</mosaic_0001>

<bundles_post_ra>
// kernel: tpu_custom_call.1
= control target key start
LH: loop header
LB: loop body
LE: loop exit
PB: predicated region body
PF: predicated region fallthrough
CT: control target
= control target key end

     0   :  { %7 = vsyncpa [#allocation3], 0  ;;  %s1145_s0 = inlined_call_operand.hbm [shape: f32[9,10], index: 0, kind: input, shape index: {}]   ;;  %s1146_s1 = inlined_call_operand.hbm [shape: f32[10,128], index: 1, kind: input, shape index: {}]   ;;  %s1147_s2 = inlined_call_operand.hbm [shape: f32[9,128], index: 2, kind: output, shape index: {}]  }
   0x1   :  { %8 = vsyncpa [#allocation6], 0 }
   0x2   :  { %9 = vsyncpa [#allocation4], 0  ;;  %s996_s9 = smov [#allocation2]   ;;  %s924_s13 = scalar_lea.hbm %s1145_s0, 256 }
   0x3   :  { %s15_s10 = sshll.u32 %s996_s9, 4  ;;  %p925_p0 = scmp.ne.s32.totalorder %s1145_s0, %s924_s13  ;;  %s16_s10 = int_to_ptr.vmem [resolvable:$true] %s15_s10 }
   0x4   :  { %p928_p1 = scmp.lt.u32.totalorder %s924_s13, %s1145_s0 }
   0x6   :  { %p930_p2 = pnand %p928_p1, %p925_p0 }
   0x8   :  { %933 = shalt.err (!%p930_p2)
}
   0x9   :  { %s934_s18 = scalar_lea.vmem %s16_s10, 256  ;;  %p939_p4 = scmp.lt.s32.totalorder %s16_s10, %s16_s10 }
   0xa   :  { %p935_p3 = scmp.ne.s32.totalorder %s16_s10, %s934_s18  ;;  %p940_p5 = scmp.lt.s32.totalorder %s934_s18, %s934_s18 }
   0xc   :  { %p941_p6 = por %p940_p5, %p939_p4 }
   0xe   :  { %p942_p7 = pnand %p941_p6, %p935_p3 }
  0x10   :  { %945 = shalt.err (!%p942_p7)
}
  0x11   :  { %s997_s19 = smov 128   ;;  %s998_s20 = smov 8  }
  0x12   :  { %21 = dma.hbm_to_vmem [thread:$0]  %s1145_s0, 256, %s16_s10, [#allocation3], %s997_s19, %s997_s19, %s998_s20  }
  0x13   :  { %s999_s23 = smov [#allocation5]   ;;  %s946_s27 = scalar_lea.hbm %s1146_s1, 256 }
  0x14   :  { %s27_s24 = sshll.u32 %s999_s23, 4  ;;  %p947_p8 = scmp.ne.s32.totalorder %s1146_s1, %s946_s27  ;;  %s28_s24 = int_to_ptr.vmem [resolvable:$true] %s27_s24 }
  0x15   :  { %p950_p9 = scmp.lt.u32.totalorder %s946_s27, %s1146_s1 }
  0x17   :  { %p952_p10 = pnand %p950_p9, %p947_p8 }
  0x19   :  { %955 = shalt.err (!%p952_p10)
}
  0x1a   :  { %s956_s4 = scalar_lea.vmem %s28_s24, 256  ;;  %p961_p12 = scmp.lt.s32.totalorder %s28_s24, %s28_s24 }
  0x1b   :  { %p957_p11 = scmp.ne.s32.totalorder %s28_s24, %s956_s4  ;;  %p962_p13 = scmp.lt.s32.totalorder %s956_s4, %s956_s4 }
  0x1d   :  { %p963_p0 = por %p962_p13, %p961_p12 }
  0x1f   :  { %p964_p1 = pnand %p963_p0, %p957_p11 }
  0x21   :  { %967 = shalt.err (!%p964_p1)
}
  0x22   :  { %33 = dma.hbm_to_vmem [thread:$0]  %s1146_s1, 256, %s28_s24, [#allocation6], %s997_s19, %s997_s19, %s998_s20  }
  0x23   :  { %990 = dma.done.wait [#allocation3], 256  }
  0x24   :  { %991 = vsyncadd [#allocation3], 4294967040 }
  0x25   :  { %992 = dma.done.wait [#allocation6], 256  }
  0x26   :  { %993 = vsyncadd [#allocation6], 4294967040  ;;  %vm51_vm0 = vcmask 1041408   ;;  %vm44_vm1 = vcmask 80896   ;;  %v42_v0 = vld [vmem:[#allocation5] sm:$0xff]  ;;  %v40_v2 = vld [vmem:[#allocation2] sm:$0xff] }
  0x27   :  { %v43_v1 = vld [vmem:[#allocation5 + $0x8] sm:$0x3]  ;;  %v56_v4 = vand.u32 4294901760, %v42_v0  ;;  %v41_v5 = vld [vmem:[#allocation2 + $0x8] sm:$0x1]  ;;  %v46_v6 = vsel %vm44_vm1, %v40_v2, 0 }
  0x28   :  { %v53_v3 = vsel %vm51_vm0, %v43_v1, 0  ;;  %v49_v8 = vsel %vm44_vm1, %v41_v5, 0  ;;  %v122_v9 = vand.u32 4294901760, %v46_v6  ;;  %v1000_v57 = vmov 683565275   ;;  %s1006_s1 = smov [#allocation7]  }
  0x29   :  { %v59_v7 = vand.u32 4294901760, %v53_v3  ;;  %v132_v10 = vand.u32 4294901760, %v49_v8  ;;  %v144_v11 = vsub.f32 %v42_v0, %v56_v4  ;;  %v1001_v61 = vmov 2475754826   ;;  %s772_s6 = sshll.u32 %s1006_s1, 4  ;;  %s773_s6 = int_to_ptr.vmem [resolvable:$true] %s772_s6 }
  0x2a   :  { %v123_v13 = vsub.f32 %v46_v6, %v122_v9  ;;  %v1002_v63 = vmov 2131351028   ;;  %v1003_v1 = vmov 2102212464   ;;  %s968_s7 = scalar_lea.vmem %s773_s6, 256  ;;  %p973_p3 = scmp.lt.s32.totalorder %s773_s6, %s773_s6 }
  0x2b   :  { %v859_v12 = vpack.c.bf16 %v59_v7, %v56_v4  ;;  %v151_v14 = vsub.f32 %v53_v3, %v59_v7  ;;  %v133_v15 = vsub.f32 %v49_v8, %v132_v10  ;;  %v145_v16 = vand.u32 4294901760, %v144_v11  ;;  %p969_p2 = scmp.ne.s32.totalorder %s773_s6, %s968_s7  ;;  %p974_p4 = scmp.lt.s32.totalorder %s968_s7, %s968_s7 }
  0x2c   :  { %v124_v17 = vand.u32 4294901760, %v123_v13  ;;  %v1004_v3 = vmov 920167782  }
  0x2d   :  { %872 = vmatprep.subr.bf16.mxu0 %v859_v12  ;;  %860 = vmatprep.subr.bf16.mxu1 %v859_v12  ;;  %v152_v18 = vand.u32 4294901760, %v151_v14  ;;  %v134_v19 = vand.u32 4294901760, %v133_v15  ;;  %v146_v20 = vsub.f32 %v144_v11, %v145_v16  ;;  %v867_v30 = vpack.c.bf16 %v151_v14, %v144_v11  ;;  %p975_p5 = por %p974_p4, %p973_p3 }
  0x2e   :  { %874 = vmatpush3.bf16.msra.mxu0 %v859_v12  ;;  %862 = vmatpush3.bf16.msra.mxu1 %v859_v12  ;;  %v125_v21 = vsub.f32 %v123_v13, %v124_v17 }
  0x2f   :  { %842 = vmatprep.mubr.f32.mxu0 %v124_v17  ;;  %v153_v22 = vsub.f32 %v151_v14, %v152_v18  ;;  %v875_v23 = vpack.c.bf16 %v152_v18, %v145_v16  ;;  %v135_v24 = vsub.f32 %v133_v15, %v134_v19  ;;  %v147_v25 = vand.u32 4294901760, %v146_v20  ;;  %p976_p6 = pnand %p975_p5, %p969_p2 }
  0x30   :  { %v126_v26 = vand.u32 4294901760, %v125_v21 }
  0x31   :  { %843 = vmatmul.mubr.f32.vlgmr.msra.gmra.mrb[0].mxu0 %v134_v19  ;;  %v154_v27 = vand.u32 4294901760, %v153_v22  ;;  %876 = vmatprep.subr.bf16.mxu0 %v875_v23  ;;  %v136_v28 = vand.u32 4294901760, %v135_v24 }
  0x32   :  { %878 = vmatpush3.bf16.msra.mxu0 %v875_v23  ;;  %849 = vmatprep.mubr.f32.mxu0 %v122_v9 }
  0x33   :  { %821 = vmatprep.mubr.f32.mxu1 %v126_v26  ;;  %v863_v29 = vpack.c.bf16 %v154_v27, %v147_v25  ;;  %880 = vmatprep.subr.bf16.mxu0 %v859_v12 }
  0x34   :  { %822 = vmatmul.mubr.f32.vlgmr.msra.gmra.mrb[0].mxu1 %v136_v28 }
  0x35   :  { %864 = vmatprep.subr.bf16.mxu1 %v863_v29  ;;  %828 = vmatprep.mubr.f32.mxu1 %v122_v9 }
  0x36   :  { %866 = vmatpush3.bf16.msra.mxu1 %v863_v29 }
  0x37   :  { %868 = vmatprep.subr.bf16.mxu1 %v867_v30 }
  0x39   :  { %850 = vmatmul.mubr.f32.vlgmr.msra.gmra.mrb[0].mxu0 %v132_v10 }
  0x3a   :  { %882 = vmatpush3.bf16.msra.mxu0 %v859_v12  ;;  %856 = vmatprep.mubr.f32.mxu0 %v122_v9 }
  0x3c   :  { %829 = vmatmul.mubr.f32.vlgmr.msra.gmra.mrb[0].mxu1 %v132_v10 }
  0x3d   :  { %870 = vmatpush3.bf16.msra.mxu1 %v867_v30  ;;  %835 = vmatprep.mubr.f32.mxu1 %v123_v13 }
  0x41   :  { %857 = vmatmul.mubr.f32.vlgmr.msra.gmra.mrb[0].mxu0 %v132_v10  ;;  %v1005_v10 = vmov 1326507024  }
  0x44   :  { %836 = vmatmul.mubr.f32.vlgmr.msra.gmra.mrb[0].mxu1 %v133_v15 }
 0x114   :  { %v858_v31 = vpop.f32.mrb[0].mxu0 }
 0x115   :  { %v547_v32 = vpop.f32.mrb[1].mxu0 }
 0x117   :  { %v837_v33 = vpop.f32.mrb[0].mxu1 }
 0x118   :  { %v1052_v34 = vadd.f32 %v858_v31, %v837_v33  ;;  %v301_v35 = vpop.f32.mrb[1].mxu1 }
 0x119   :  { %v1054_v36 = vadd.f32 %v547_v32, %v301_v35 }
 0x11a   :  { %v660_v37 = vand.u32 2147483647, %v1052_v34  ;;  %v663_v38 = vand.u32 2139095040, %v1052_v34  ;;  %vm662_vm0 = vcmp.lt.s32.totalorder %v1052_v34, 0 }
 0x11b   :  { %v560_v39 = vand.u32 2139095040, %v1054_v36  ;;  %v557_v42 = vand.u32 2147483647, %v1054_v36 }
 0x11c   :  { %v664_v40 = vshrl.u32 %v663_v38, 23  ;;  %v667_v41 = vand.u32 8388607, %v660_v37  ;;  %vm1107_vm1 = vcmp.le.f32.partialorder %v660_v37, 0.7853982 }
 0x11d   :  { %v561_v43 = vshrl.u32 %v560_v39, 23  ;;  %v1064_v48 = vand.u32 8388607, %v557_v42 }
 0x11e   :  { %v789_v44 = vadd.s32 4294967169, %v664_v40  ;;  %v668_v47 = vor.u32 8388608, %v667_v41 }
 0x11f   :  { %v785_v45 = vadd.s32 4294967169, %v561_v43  ;;  %v565_v55 = vor.u32 8388608, %v1064_v48 }
 0x120   :  { %v670_v46 = vadd.s32 1, %v789_v44  ;;  %v1066_v54 = vshll.u32 %v668_v47, 8 }
 0x121   :  { %v567_v49 = vadd.s32 1, %v785_v45 }
 0x122   :  { %vm671_vm2 = vcmp.gt.s32.totalorder %v670_v46, 0 }
 0x123   :  { %v672_v50 = vsel %vm671_vm2, %v670_v46, 0  ;;  %vm568_vm3 = vcmp.gt.s32.totalorder %v567_v49, 0  ;;  %vm559_vm2 = vcmp.lt.s32.totalorder %v1054_v36, 0 }
 0x124   :  { %v673_v51 = vshrl.u32 %v672_v50, 5  ;;  %v674_v52 = vand.u32 31, %v672_v50  ;;  %v569_v53 = vsel %vm568_vm3, %v567_v49, 0  ;;  %v605_v49 = vshll.u32 %v565_v55, 8 }
 0x125   :  { %v1069_v59 = vshrl.u32 %v569_v53, 5  ;;  %v571_v60 = vand.u32 31, %v569_v53  ;;  %vm1119_vm3 = vcmp.le.f32.partialorder %v557_v42, 0.7853982 }
 0x126   :  { %v675_v56 = vsub.s32 32, %v674_v52  ;;  %v677_v58 = vshll.u32 %v1000_v57, %v674_v52  ;;  %v680_v62 = vshll.u32 %v1001_v61, %v674_v52  ;;  %v683_v0 = vshll.u32 %v1002_v63, %v674_v52 }
 0x127   :  { %v686_v2 = vshll.u32 %v1003_v1, %v674_v52  ;;  %v689_v4 = vshll.u32 %v1004_v3, %v674_v52  ;;  %vm692_vm4 = vcmp.lt.s32.totalorder %v673_v51, 1  ;;  %vm693_vm5 = vcmp.lt.s32.totalorder %v673_v51, 2 }
 0x128   :  { %v678_v5 = vshrl.u32 %v1001_v61, %v675_v56  ;;  %v681_v6 = vshrl.u32 %v1002_v63, %v675_v56  ;;  %v684_v7 = vshrl.u32 %v1003_v1, %v675_v56  ;;  %v676_v8 = vshrl.u32 %v1000_v57, %v675_v56 }
 0x129   :  { %v687_v9 = vshrl.u32 %v1004_v3, %v675_v56  ;;  %v690_v11 = vshrl.u32 %v1005_v10, %v675_v56  ;;  %v572_v15 = vsub.s32 32, %v571_v60  ;;  %vm694_vm6 = vcmp.lt.s32.totalorder %v673_v51, 3 }
 0x12a   :  { %v679_v12 = vor.u32 %v678_v5, %v677_v58  ;;  %v682_v13 = vor.u32 %v681_v6, %v680_v62  ;;  %v685_v14 = vor.u32 %v684_v7, %v683_v0  ;;  %vm695_vm7 = vcmp.lt.s32.totalorder %v673_v51, 4 }
 0x12b   :  { %v688_v16 = vor.u32 %v687_v9, %v686_v2  ;;  %v691_v17 = vor.u32 %v690_v11, %v689_v4  ;;  %v574_v25 = vshll.u32 %v1000_v57, %v571_v60  ;;  %v575_v28 = vshrl.u32 %v1001_v61, %v572_v15 }
 0x12c   :  { %v696_v18 = vsel %vm692_vm4, %v676_v8, %v679_v12  ;;  %v697_v19 = vsel %vm695_vm7, %v685_v14, 2102212464  ;;  %v700_v20 = vsel %vm692_vm4, %v679_v12, %v682_v13  ;;  %v704_v21 = vsel %vm692_vm4, %v682_v13, %v685_v14 }
 0x12d   :  { %v698_v22 = vsel %vm694_vm6, %v682_v13, %v697_v19  ;;  %v701_v23 = vsel %vm695_vm7, %v688_v16, 920167782  ;;  %v705_v24 = vsel %vm695_vm7, %v691_v17, 1326507024  ;;  %v577_v29 = vshll.u32 %v1001_v61, %v571_v60 }
 0x12e   :  { %v702_v26 = vsel %vm694_vm6, %v685_v14, %v701_v23  ;;  %v706_v27 = vsel %vm694_vm6, %v688_v16, %v705_v24  ;;  %v699_v30 = vsel %vm693_vm5, %v696_v18, %v698_v22  ;;  %v578_v33 = vshrl.u32 %v1002_v63, %v572_v15 }
 0x12f   :  { %v703_v31 = vsel %vm693_vm5, %v700_v20, %v702_v26  ;;  %v707_v32 = vsel %vm693_vm5, %v704_v21, %v706_v27  ;;  %v576_v41 = vor.u32 %v575_v28, %v574_v25  ;;  %v580_v44 = vshll.u32 %v1002_v63, %v571_v60 }
 0x130   :  { %v1078_v35 = vmul.u32.u64.low %v1066_v54, %v707_v32  ;;  %v1079_v38 = vmul.u32.u64.high %v1066_v54, %v707_v32, %v1078_v35  ;;  %v1082_v39 = vmul.u32.u64.low %v1066_v54, %v703_v31  ;;  %v1083_v40 = vmul.u32.u64.high %v1066_v54, %v703_v31, %v1082_v39 }
 0x131   :  { %v579_v43 = vor.u32 %v578_v33, %v577_v29  ;;  %v581_v45 = vshrl.u32 %v1003_v1, %v572_v15  ;;  %v583_v46 = vshll.u32 %v1003_v1, %v571_v60  ;;  %v584_v47 = vshrl.u32 %v1004_v3, %v572_v15 }
 0x132   :  { %v587_v48 = vshrl.u32 %v1005_v10, %v572_v15  ;;  %v715_v50 = vmul.u32 %v1066_v54, %v699_v30  ;;  %v573_v51 = vshrl.u32 %v1000_v57, %v572_v15  ;;  %v586_v53 = vshll.u32 %v1004_v3, %v571_v60 }
 0x133   :  { %v582_v52 = vor.u32 %v581_v45, %v580_v44  ;;  %vm717_vm8 = vc.u32 %v1079_v38, %v1082_v39  ;;  %v718_v56 = vadd.s32 1, %v1083_v40  ;;  %v585_v58 = vor.u32 %v584_v47, %v583_v46 }
 0x134   :  { %vm589_vm9 = vcmp.lt.s32.totalorder %v1069_v59, 1  ;;  %v588_v61 = vor.u32 %v587_v48, %v586_v53  ;;  %vm591_vm10 = vcmp.lt.s32.totalorder %v1069_v59, 3  ;;  %vm592_vm11 = vcmp.lt.s32.totalorder %v1069_v59, 4 }
 0x135   :  { %v597_v62 = vsel %vm589_vm9, %v576_v41, %v579_v43  ;;  %v719_v55 = vsel %vm717_vm8, %v718_v56, %v1083_v40  ;;  %v594_v63 = vsel %vm592_vm11, %v582_v52, 2102212464  ;;  %v598_v54 = vsel %vm592_vm11, %v585_v58, 920167782 }
 0x136   :  { %v601_v57 = vsel %vm589_vm9, %v579_v43, %v582_v52  ;;  %v720_v0 = vadd.s32 %v719_v55, %v715_v50  ;;  %vm590_vm12 = vcmp.lt.s32.totalorder %v1069_v59, 2  ;;  %v599_v60 = vsel %vm591_vm10, %v582_v52, %v598_v54 }
 0x137   :  { %v602_v1 = vsel %vm592_vm11, %v588_v61, 1326507024  ;;  %v593_v2 = vsel %vm589_vm9, %v573_v51, %v576_v41  ;;  %v595_v3 = vsel %vm591_vm10, %v579_v43, %v594_v63  ;;  %v600_v4 = vsel %vm590_vm12, %v597_v62, %v599_v60 }
 0x138   :  { %v603_v5 = vsel %vm591_vm10, %v585_v58, %v602_v1  ;;  %v721_v6 = vadd.s32 536870912, %v720_v0  ;;  %v1093_v8 = vmul.u32.u64.low %v605_v49, %v600_v4  ;;  %v1094_v9 = vmul.u32.u64.high %v605_v49, %v600_v4, %v1093_v8 }
 0x139   :  { %v604_v7 = vsel %vm590_vm12, %v601_v57, %v603_v5  ;;  %v596_v13 = vsel %vm590_vm12, %v593_v2, %v595_v3  ;;  %v716_v29 = vadd.s32 %v1082_v39, %v1079_v38  ;;  %vm752_vm7 = vweird.f32 %v1052_v34 }
 0x13a   :  { %v1096_v10 = vmul.u32.u64.low %v605_v49, %v604_v7  ;;  %v1097_v11 = vmul.u32.u64.high %v605_v49, %v604_v7, %v1096_v10  ;;  %v722_v12 = vshrl.u32 %v721_v6, 30  ;;  %v615_v15 = vadd.s32 1, %v1094_v9 }
 0x13b   :  { %v612_v59 = vmul.u32 %v605_v49, %v596_v13  ;;  %vm649_vm11 = vweird.f32 %v1054_v36 }
 0x13c   :  { %v723_v14 = vshll.u32 %v722_v12, 30  ;;  %vm614_vm13 = vc.u32 %v1097_v11, %v1093_v8  ;;  %v613_v50 = vadd.s32 %v1093_v8, %v1097_v11  ;;  %v746_v54 = vsub.s32 4, %v722_v12 }
 0x13d   :  { %v616_v17 = vsel %vm614_vm13, %v615_v15, %v1094_v9 }
 0x13e   :  { %v724_v16 = vsub.s32 %v720_v0, %v723_v14  ;;  %v617_v18 = vadd.s32 %v616_v17, %v612_v59  ;;  %v747_v2 = vsel %vm662_vm0, %v746_v54, %v722_v12 }
 0x13f   :  { %v749_v4 = vsel %vm1107_vm1, 0, %v747_v2 }
 0x140   :  { %v726_v19 = vsub.s32 0, %v724_v16  ;;  %v618_v20 = vadd.s32 536870912, %v617_v18  ;;  %v753_v8 = vand.u32 3, %v749_v4 }
 0x142   :  { %v790_v21 = vmin.u32 %v726_v19, %v724_v16  ;;  %v619_v22 = vshrl.u32 %v618_v20, 30  ;;  %vm758_vm4 = vcmp.eq.s32.totalorder %v753_v8, 2  ;;  %vm755_vm5 = vcmp.eq.s32.totalorder %v753_v8, 0 }
 0x143   :  { %vm754_vm6 = vcmp.lt.s32.totalorder %v753_v8, 2 }
 0x144   :  { %v728_v23 = vclz %v790_v21  ;;  %v620_v24 = vshll.u32 %v619_v22, 30  ;;  %v643_v7 = vsub.s32 4, %v619_v22 }
 0x146   :  { %v791_v25 = vadd.s32 4294967294, %v728_v23  ;;  %v621_v26 = vsub.s32 %v617_v18, %v620_v24  ;;  %v644_v13 = vsel %vm559_vm2, %v643_v7, %v619_v22 }
 0x147   :  { %v646_v59 = vsel %vm1119_vm3, 0, %v644_v13 }
 0x148   :  { %vm792_vm14 = vcmp.lt.s32.totalorder %v791_v25, 0  ;;  %v623_v28 = vsub.s32 0, %v621_v26  ;;  %v650_v18 = vand.u32 3, %v646_v59 }
 0x149   :  { %v731_v27 = vsel %vm792_vm14, 0, %v791_v25 }
 0x14a   :  { %v732_v30 = vsub.s32 32, %v731_v27  ;;  %v736_v31 = vsub.s32 4294967266, %v731_v27  ;;  %v786_v32 = vmin.u32 %v623_v28, %v621_v26  ;;  %v733_v33 = vshll.u32 %v724_v16, %v731_v27 }
 0x14b   :  { %vm655_vm8 = vcmp.eq.s32.totalorder %v650_v18, 2  ;;  %vm652_vm9 = vcmp.eq.s32.totalorder %v650_v18, 0  ;;  %vm651_vm10 = vcmp.lt.s32.totalorder %v650_v18, 2 }
 0x14c   :  { %v734_v35 = vshrl.u32 %v716_v29, %v732_v30  ;;  %v737_v40 = vadd.s32 127, %v736_v31  ;;  %v625_v41 = vclz %v786_v32 }
 0x14e   :  { %v735_v43 = vor.u32 %v734_v35, %v733_v33  ;;  %v738_v44 = vshll.u32 %v737_v40, 23  ;;  %v787_v45 = vadd.s32 4294967294, %v625_v41 }
 0x150   :  { %v739_v46 = vor.u32 4788187, %v738_v44  ;;  %vm788_vm15 = vcmp.lt.s32.totalorder %v787_v45, 0  ;;  %v742_v48 = vcvt.s32.f32 %v735_v43 }
 0x151   :  { %v628_v49 = vsel %vm788_vm15, 0, %v787_v45 }
 0x152   :  { %v740_v47 = vand.u32 2147483647, %v739_v46  ;;  %v629_v51 = vsub.s32 32, %v628_v49  ;;  %v633_v52 = vsub.s32 4294967266, %v628_v49  ;;  %v630_v39 = vshll.u32 %v621_v26, %v628_v49 }
 0x154   :  { %v743_v38 = vmul.f32 %v742_v48, %v740_v47  ;;  %v631_v53 = vshrl.u32 %v613_v50, %v629_v51  ;;  %v634_v56 = vadd.s32 127, %v633_v52 }
 0x156   :  { %v744_v58 = vxor.u32 2147483648, %v743_v38  ;;  %v632_v61 = vor.u32 %v631_v53, %v630_v39  ;;  %v635_v62 = vshll.u32 %v634_v56, 23 }
 0x158   :  { %v745_v63 = vsel %vm662_vm0, %v744_v58, %v743_v38  ;;  %v636_v0 = vor.u32 4788187, %v635_v62  ;;  %v639_v1 = vcvt.s32.f32 %v632_v61 }
 0x159   :  { %v748_v57 = vsel %vm1107_vm1, %v1052_v34, %v745_v63 }
 0x15a   :  { %912 = vcosq.f32 %v748_v57  ;;  %v637_v60 = vand.u32 2147483647, %v636_v0 }
 0x15b   :  { %914 = vsinq.f32 %v748_v57 }
 0x15c   :  { %v640_v3 = vmul.f32 %v639_v1, %v637_v60 }
 0x15e   :  { %v641_v37 = vxor.u32 2147483648, %v640_v3 }
 0x160   :  { %v642_v6 = vsel %vm559_vm2, %v641_v37, %v640_v3 }
 0x161   :  { %v645_v9 = vsel %vm1119_vm3, %v1054_v36, %v642_v6 }
 0x162   :  { %916 = vcosq.f32 %v645_v9 }
 0x163   :  { %918 = vsinq.f32 %v645_v9 }
 0x164   :  { %v913_v10 = vpop.eup %912 }
 0x165   :  { %v915_v11 = vpop.eup %914  ;;  %v759_v12 = vxor.u32 2147483648, %v913_v10 }
 0x166   :  { %v756_v14 = vxor.u32 2147483648, %v915_v11 }
 0x167   :  { %v760_v42 = vsel %vm758_vm4, %v759_v12, %v915_v11 }
 0x168   :  { %v757_v15 = vsel %vm755_vm5, %v913_v10, %v756_v14 }
 0x169   :  { %v761_v16 = vsel %vm754_vm6, %v757_v15, %v760_v42 }
 0x16a   :  { %v762_v17 = vsel %vm752_vm7, nan, %v761_v16 }
 0x16b   :  { %920 = vtanh.f32 %v762_v17 }
 0x16c   :  { %v917_v19 = vpop.eup %916 }
 0x16d   :  { %v919_v20 = vpop.eup %918  ;;  %v656_v21 = vxor.u32 2147483648, %v917_v19 }
 0x16e   :  { %v653_v23 = vxor.u32 2147483648, %v919_v20 }
 0x16f   :  { %v657_v22 = vsel %vm655_vm8, %v656_v21, %v919_v20 }
 0x170   :  { %v654_v24 = vsel %vm652_vm9, %v917_v19, %v653_v23 }
 0x171   :  { %v658_v25 = vsel %vm651_vm10, %v654_v24, %v657_v22 }
 0x172   :  { %v659_v26 = vsel %vm649_vm11, nan, %v658_v25 }
 0x173   :  { %922 = vtanh.f32 %v659_v26 }
 0x175   :  { %v921_v27 = vpop.eup %920 }
 0x176   :  { %766 = vst [vmem:[#allocation7 + $0x8] sm:$0x1] %v921_v27 }
 0x17d   :  { %v923_v34 = vpop.eup %922 }
 0x17e   :  { %765 = vst [vmem:[#allocation7] sm:$0xff] %v923_v34 }
 0x17f   :  { %979 = shalt.err (!%p976_p6)
}
 0x180   :  { %s980_s10 = scalar_lea.hbm %s1147_s2, 256 }
 0x181   :  { %p981_p7 = scmp.ne.s32.totalorder %s1147_s2, %s980_s10  ;;  %p984_p8 = scmp.lt.u32.totalorder %s980_s10, %s1147_s2 }
 0x183   :  { %p986_p9 = pnand %p984_p8, %p981_p7 }
 0x185   :  { %989 = shalt.err (!%p986_p9)
}
 0x186   :  { %778 = dma.vmem_to_hbm [thread:$0]  %s773_s6, 256, %s1147_s2, [#allocation4], %s997_s19, %s997_s19, %s998_s20  }
 0x187   :  { %994 = dma.done.wait [#allocation4], 256  }
 0x188   :  { %995 = vsyncadd [#allocation4], 4294967040 }
 0x189   :  { %782 = vsyncpa [#allocation3], 1 }
 0x18a   :  { %783 = vsyncpa [#allocation6], 1 }
 0x18b   :  { %784 = vsyncpa [#allocation4], 1 }

</bundles_post_ra>
